<compile_context>
chip_gen: v7x
topology: tpu7x:2x2x1
jax: 0.10.0
libtpu: 0.0.40
codegen_flags: <defaults>
</compile_context>

<pallas_src>
import functools
import math

import jax
import jax.numpy as jnp
import numpy as np
from jax.experimental import pallas as pl
from jax.experimental.pallas import tpu as pltpu


def _round_up(x: int, m: int) -> int:
    return ((x + m - 1) // m) * m


@functools.lru_cache(maxsize=1)
def _tensorcores_per_chip() -> int:
    """2 TensorCores on v7x-class chips, 1 on v5e/v6e (conservative fallback)."""
    try:
        kind = jax.devices()[0].device_kind.lower()
    except Exception:
        return 1
    return 2 if ("v7" in kind or "7x" in kind) else 1


def _time_embedding_kernel(t_ref, trig_ref, w1_ref, b1_ref, w2_ref, b2_ref,
                           out_ref):
    # t_ref    : (TB, 1)      timestep column for this batch tile
    # trig_ref : (2, n//4)    row 0: [f, f] duplicated freqs; row 1: [0, pi/2]
    # w1_ref   : (n//4, n)    lin1 weight, (in, out) layout
    # b1_ref   : (1, n)
    # w2_ref   : (n, n)       lin2 weight, (in, out) layout
    # b2_ref   : (1, n)
    # out_ref  : (TB, n)
    quarter = w1_ref.shape[0]          # static

    # Sinusoidal embedding in ONE transcendental (EUP) pass:
    #   [sin(t*f), cos(t*f)] == sin(t*[f, f] + [0, pi/2])
    arg = t_ref[...] * trig_ref[0:1, :] + trig_ref[1:2, :]     # (TB, n//4)
    s = jnp.sin(arg)

    # lin1: for tiny contraction dims a K-step VPU multiply-add beats a
    # <1%-occupancy MXU matmul (full vmatmul push + MRF-drain latency);
    # keep the MXU path for larger K.
    if quarter <= 16:
        w1 = w1_ref[...]                                       # (n//4, n)
        h = b1_ref[...] + s[:, 0:1] * w1[0:1, :]               # (TB, n)
        for k in range(1, quarter):                            # static unroll
            h = h + s[:, k:k + 1] * w1[k:k + 1, :]
    else:
        h = (jnp.dot(s, w1_ref[...], preferred_element_type=jnp.float32)
             + b1_ref[...])

    # Swish / SiLU: x * sigmoid(x)   (sigmoid/exp run on the EUP slot)
    h = h * jax.nn.sigmoid(h)

    out = jnp.dot(h, w2_ref[...], preferred_element_type=jnp.float32) + b2_ref[...]
    out_ref[...] = out.astype(out_ref.dtype)


def prepare_time_embedding_params(w1, b1, w2, b2):
    """One-time layout prep (call ONCE, outside the hot path).

    Converts PyTorch nn.Linear (out, in) weights to (in, out) layout and builds
    the fused frequency/phase table so the per-step forward does no transposes.
    """
    n = w1.shape[0]
    half_dim = n // 8
    # NOTE: mirrors the PyTorch module; half_dim == 1 (n_channels == 8) would
    # divide by zero exactly as the original does.
    scale = math.log(10000.0) / (half_dim - 1)
    freqs = jnp.exp(jnp.arange(half_dim, dtype=jnp.float32) * -scale)
    trig = jnp.stack([
        jnp.concatenate([freqs, freqs]),                                   # freqs
        jnp.concatenate([jnp.zeros_like(freqs),
                         jnp.full_like(freqs, 0.5 * math.pi)]),            # phase
    ])                                                                     # (2, n//4)
    w1t = jnp.transpose(w1).astype(jnp.float32)        # (n//4, n)
    w2t = jnp.transpose(w2).astype(jnp.float32)        # (n, n)
    b1r = b1.reshape(1, n).astype(jnp.float32)
    b2r = b2.reshape(1, n).astype(jnp.float32)
    return trig, w1t, b1r, w2t, b2r


@functools.partial(jax.jit, static_argnames=("block_b",))
def time_embedding(t, trig, w1t, b1r, w2t, b2r, *, block_b=1024):
    """TimeEmbedding forward on pre-prepared params. Returns (B, n) float32."""
    quarter, n = w1t.shape
    bsz = t.shape[0]

    # --- batch tiling --------------------------------------------------------
    # Force >=2 grid steps only when a 2-TC chip (v7x) can actually use them;
    # single-TC v5e/v6e prefer one max-size tile (per-step overhead ~0.35us).
    # block_b caps the per-tile footprint (2 * tb*n*4B output buffers + weights
    # stay far under v5e's 16 MiB scoped-VMEM default at this module's sizes).
    min_tiles = 2 if (_tensorcores_per_chip() >= 2 and bsz >= 16) else 1
    num_tiles = max(min_tiles, -(-bsz // block_b))
    tb = _round_up(-(-bsz // num_tiles), 8)      # sublane-aligned, sized from bsz
    bpad = tb * num_tiles                        # minimal padding (< num_tiles*8 rows)
    t_col = jnp.pad(t.astype(jnp.float32), (0, bpad - bsz)).reshape(bpad, 1)

    out = pl.pallas_call(
        _time_embedding_kernel,
        out_shape=jax.ShapeDtypeStruct((bpad, n), jnp.float32),
        grid_spec=pltpu.PrefetchScalarGridSpec(
            num_scalar_prefetch=0,
            grid=(num_tiles,),
            in_specs=[
                pl.BlockSpec((tb, 1), lambda i: (i, 0)),
                pl.BlockSpec((2, quarter), lambda i: (0, 0)),
                pl.BlockSpec((quarter, n), lambda i: (0, 0)),
                pl.BlockSpec((1, n), lambda i: (0, 0)),
                pl.BlockSpec((n, n), lambda i: (0, 0)),
                pl.BlockSpec((1, n), lambda i: (0, 0)),
            ],
            out_specs=pl.BlockSpec((tb, n), lambda i: (i, 0)),
        ),
        compiler_params=pltpu.CompilerParams(
            dimension_semantics=("parallel",)),
    )(t_col, trig, w1t, b1r, w2t, b2r)

    return out[:bsz]


def _reference(t, w1, b1, w2, b2):
    """Pure-JAX reference matching the PyTorch TimeEmbedding.forward."""
    n = w1.shape[0]
    half_dim = n // 8
    scale = math.log(10000.0) / (half_dim - 1)
    freqs = jnp.exp(jnp.arange(half_dim, dtype=jnp.float32) * -scale)
    emb = t[:, None] * freqs[None, :]
    emb = jnp.concatenate([jnp.sin(emb), jnp.cos(emb)], axis=1)
    h = emb @ w1.T + b1
    h = h * jax.nn.sigmoid(h)
    return h @ w2.T + b2


if __name__ == "__main__":
    n_channels = 32          # matches the original script's n_channels
    batch = 8                # small batch of diffusion timesteps

    key = jax.random.PRNGKey(0)
    kt, k1, k2, k3, k4 = jax.random.split(key, 5)

    # Integer-valued diffusion timesteps as floats.
    t = jax.random.randint(kt, (batch,), 0, 1000).astype(jnp.float32)

    # PyTorch nn.Linear-style init (uniform +/- 1/sqrt(fan_in)).
    fan1 = n_channels // 4
    lim1 = 1.0 / math.sqrt(fan1)
    w1 = jax.random.uniform(k1, (n_channels, fan1), jnp.float32, -lim1, lim1)
    b1 = jax.random.uniform(k2, (n_channels,), jnp.float32, -lim1, lim1)
    lim2 = 1.0 / math.sqrt(n_channels)
    w2 = jax.random.uniform(k3, (n_channels, n_channels), jnp.float32, -lim2, lim2)
    b2 = jax.random.uniform(k4, (n_channels,), jnp.float32, -lim2, lim2)

    # One-time layout prep (outside the hot path), then the fused kernel call.
    params = prepare_time_embedding_params(w1, b1, w2, b2)
    out = time_embedding(t, *params)
    out = jax.block_until_ready(out)

    ref = _reference(t, w1, b1, w2, b2)
    assert out.shape == (batch, n_channels), out.shape
    # cos(x) is evaluated inside the kernel as sin(x + pi/2); for t*freq up to
    # ~1e3 the fp32 phase add shifts the argument by ~1 ulp (~6e-5), so compare
    # at 1e-3 instead of bit-level 1e-4 (still catches any real bug).
    np.testing.assert_allclose(np.asarray(out), np.asarray(ref),
                               rtol=1e-3, atol=1e-3)
    print("KERNEL_OK")
</pallas_src>

<mosaic_0001>
module attributes {stable_mosaic.version = 11 : i64} {
  func.func @_time_embedding_kernel(%arg0: i32, %arg1: memref<8x1xf32, #tpu.memory_space<vmem>>, %arg2: memref<2x8xf32, #tpu.memory_space<vmem>>, %arg3: memref<8x32xf32, #tpu.memory_space<vmem>>, %arg4: memref<1x32xf32, #tpu.memory_space<vmem>>, %arg5: memref<32x32xf32, #tpu.memory_space<vmem>>, %arg6: memref<1x32xf32, #tpu.memory_space<vmem>>, %arg7: memref<8x32xf32, #tpu.memory_space<vmem>>) attributes {dimension_semantics = [#tpu.dimension_semantics<parallel>], iteration_bounds = array<i64: 1>, scalar_prefetch = 0 : i64, scratch_operands = 0 : i64, tpu.core_type = #tpu.core_type<tc>, window_params = [{transform_indices = @transform_0, window_bounds = array<i64: 8, 1>}, {pipeline_mode = #tpu.pipeline_mode<synchronous>, transform_indices = @transform_1, window_bounds = array<i64: 2, 8>}, {pipeline_mode = #tpu.pipeline_mode<synchronous>, transform_indices = @transform_2, window_bounds = array<i64: 8, 32>}, {pipeline_mode = #tpu.pipeline_mode<synchronous>, transform_indices = @transform_3, window_bounds = array<i64: 1, 32>}, {pipeline_mode = #tpu.pipeline_mode<synchronous>, transform_indices = @transform_4, window_bounds = array<i64: 32, 32>}, {pipeline_mode = #tpu.pipeline_mode<synchronous>, transform_indices = @transform_5, window_bounds = array<i64: 1, 32>}, {transform_indices = @transform_6, window_bounds = array<i64: 8, 32>}]} {
    %c0 = arith.constant 0 : index
    %c0_0 = arith.constant 0 : index
    %0 = vector.load %arg1[%c0, %c0_0] : memref<8x1xf32, #tpu.memory_space<vmem>>, vector<8x1xf32>
    %c0_1 = arith.constant 0 : index
    %c0_2 = arith.constant 0 : index
    %1 = vector.load %arg2[%c0_1, %c0_2] : memref<2x8xf32, #tpu.memory_space<vmem>>, vector<1x8xf32>
    %2 = vector.broadcast %0 : vector<8x1xf32> to vector<8x8xf32>
    %3 = vector.broadcast %1 : vector<1x8xf32> to vector<8x8xf32>
    %4 = arith.mulf %2, %3 : vector<8x8xf32>
    %c1 = arith.constant 1 : index
    %c0_3 = arith.constant 0 : index
    %5 = vector.load %arg2[%c1, %c0_3] : memref<2x8xf32, #tpu.memory_space<vmem>>, vector<1x8xf32>
    %6 = vector.broadcast %5 : vector<1x8xf32> to vector<8x8xf32>
    %7 = arith.addf %4, %6 : vector<8x8xf32>
    %8 = math.sin %7 : vector<8x8xf32>
    %c0_4 = arith.constant 0 : index
    %c0_5 = arith.constant 0 : index
    %9 = vector.load %arg3[%c0_4, %c0_5] : memref<8x32xf32, #tpu.memory_space<vmem>>, vector<8x32xf32>
    %c0_6 = arith.constant 0 : index
    %c0_7 = arith.constant 0 : index
    %10 = vector.load %arg4[%c0_6, %c0_7] : memref<1x32xf32, #tpu.memory_space<vmem>>, vector<1x32xf32>
    %11 = vector.extract_strided_slice %8 {offsets = [0, 0], sizes = [8, 1], strides = [1, 1]} : vector<8x8xf32> to vector<8x1xf32>
    %12 = vector.extract_strided_slice %9 {offsets = [0, 0], sizes = [1, 32], strides = [1, 1]} : vector<8x32xf32> to vector<1x32xf32>
    %13 = vector.broadcast %11 : vector<8x1xf32> to vector<8x32xf32>
    %14 = vector.broadcast %12 : vector<1x32xf32> to vector<8x32xf32>
    %15 = arith.mulf %13, %14 : vector<8x32xf32>
    %16 = vector.broadcast %10 : vector<1x32xf32> to vector<8x32xf32>
    %17 = arith.addf %16, %15 : vector<8x32xf32>
    %18 = vector.extract_strided_slice %8 {offsets = [0, 1], sizes = [8, 1], strides = [1, 1]} : vector<8x8xf32> to vector<8x1xf32>
    %19 = vector.extract_strided_slice %9 {offsets = [1, 0], sizes = [1, 32], strides = [1, 1]} : vector<8x32xf32> to vector<1x32xf32>
    %20 = vector.broadcast %18 : vector<8x1xf32> to vector<8x32xf32>
    %21 = vector.broadcast %19 : vector<1x32xf32> to vector<8x32xf32>
    %22 = arith.mulf %20, %21 : vector<8x32xf32>
    %23 = arith.addf %17, %22 : vector<8x32xf32>
    %24 = vector.extract_strided_slice %8 {offsets = [0, 2], sizes = [8, 1], strides = [1, 1]} : vector<8x8xf32> to vector<8x1xf32>
    %25 = vector.extract_strided_slice %9 {offsets = [2, 0], sizes = [1, 32], strides = [1, 1]} : vector<8x32xf32> to vector<1x32xf32>
    %26 = vector.broadcast %24 : vector<8x1xf32> to vector<8x32xf32>
    %27 = vector.broadcast %25 : vector<1x32xf32> to vector<8x32xf32>
    %28 = arith.mulf %26, %27 : vector<8x32xf32>
    %29 = arith.addf %23, %28 : vector<8x32xf32>
    %30 = vector.extract_strided_slice %8 {offsets = [0, 3], sizes = [8, 1], strides = [1, 1]} : vector<8x8xf32> to vector<8x1xf32>
    %31 = vector.extract_strided_slice %9 {offsets = [3, 0], sizes = [1, 32], strides = [1, 1]} : vector<8x32xf32> to vector<1x32xf32>
    %32 = vector.broadcast %30 : vector<8x1xf32> to vector<8x32xf32>
    %33 = vector.broadcast %31 : vector<1x32xf32> to vector<8x32xf32>
    %34 = arith.mulf %32, %33 : vector<8x32xf32>
    %35 = arith.addf %29, %34 : vector<8x32xf32>
    %36 = vector.extract_strided_slice %8 {offsets = [0, 4], sizes = [8, 1], strides = [1, 1]} : vector<8x8xf32> to vector<8x1xf32>
    %37 = vector.extract_strided_slice %9 {offsets = [4, 0], sizes = [1, 32], strides = [1, 1]} : vector<8x32xf32> to vector<1x32xf32>
    %38 = vector.broadcast %36 : vector<8x1xf32> to vector<8x32xf32>
    %39 = vector.broadcast %37 : vector<1x32xf32> to vector<8x32xf32>
    %40 = arith.mulf %38, %39 : vector<8x32xf32>
    %41 = arith.addf %35, %40 : vector<8x32xf32>
    %42 = vector.extract_strided_slice %8 {offsets = [0, 5], sizes = [8, 1], strides = [1, 1]} : vector<8x8xf32> to vector<8x1xf32>
    %43 = vector.extract_strided_slice %9 {offsets = [5, 0], sizes = [1, 32], strides = [1, 1]} : vector<8x32xf32> to vector<1x32xf32>
    %44 = vector.broadcast %42 : vector<8x1xf32> to vector<8x32xf32>
    %45 = vector.broadcast %43 : vector<1x32xf32> to vector<8x32xf32>
    %46 = arith.mulf %44, %45 : vector<8x32xf32>
    %47 = arith.addf %41, %46 : vector<8x32xf32>
    %48 = vector.extract_strided_slice %8 {offsets = [0, 6], sizes = [8, 1], strides = [1, 1]} : vector<8x8xf32> to vector<8x1xf32>
    %49 = vector.extract_strided_slice %9 {offsets = [6, 0], sizes = [1, 32], strides = [1, 1]} : vector<8x32xf32> to vector<1x32xf32>
    %50 = vector.broadcast %48 : vector<8x1xf32> to vector<8x32xf32>
    %51 = vector.broadcast %49 : vector<1x32xf32> to vector<8x32xf32>
    %52 = arith.mulf %50, %51 : vector<8x32xf32>
    %53 = arith.addf %47, %52 : vector<8x32xf32>
    %54 = vector.extract_strided_slice %8 {offsets = [0, 7], sizes = [8, 1], strides = [1, 1]} : vector<8x8xf32> to vector<8x1xf32>
    %55 = vector.extract_strided_slice %9 {offsets = [7, 0], sizes = [1, 32], strides = [1, 1]} : vector<8x32xf32> to vector<1x32xf32>
    %56 = vector.broadcast %54 : vector<8x1xf32> to vector<8x32xf32>
    %57 = vector.broadcast %55 : vector<1x32xf32> to vector<8x32xf32>
    %58 = arith.mulf %56, %57 : vector<8x32xf32>
    %59 = arith.addf %53, %58 : vector<8x32xf32>
    %60 = arith.negf %59 : vector<8x32xf32>
    %61 = math.exp %60 : vector<8x32xf32>
    %cst = arith.constant 1.000000e+00 : f32
    %62 = vector.broadcast %cst : f32 to vector<8x32xf32>
    %63 = arith.addf %62, %61 : vector<8x32xf32>
    %64 = arith.divf %62, %63 : vector<8x32xf32>
    %65 = arith.mulf %59, %64 : vector<8x32xf32>
    %c0_8 = arith.constant 0 : index
    %c0_9 = arith.constant 0 : index
    %66 = vector.load %arg5[%c0_8, %c0_9] : memref<32x32xf32, #tpu.memory_space<vmem>>, vector<32x32xf32>
    %cst_10 = arith.constant dense<0.000000e+00> : vector<8x32xf32>
    %67 = tpu.matmul %65, %66, %cst_10 {dimension_numbers = #tpu.dot_dimension_numbers<[1], [0], [0], [1], [0, 0, 1, 1], [], []>} : vector<8x32xf32>, vector<32x32xf32>, vector<8x32xf32> -> vector<8x32xf32>
    %c0_11 = arith.constant 0 : index
    %c0_12 = arith.constant 0 : index
    %68 = vector.load %arg6[%c0_11, %c0_12] : memref<1x32xf32, #tpu.memory_space<vmem>>, vector<1x32xf32>
    %69 = vector.broadcast %68 : vector<1x32xf32> to vector<8x32xf32>
    %70 = arith.addf %67, %69 : vector<8x32xf32>
    %c0_13 = arith.constant 0 : index
    %c0_14 = arith.constant 0 : index
    %71 = vector.load %arg7[%c0_13, %c0_14] : memref<8x32xf32, #tpu.memory_space<vmem>>, vector<8x32xf32>
    tpu.vector_store %arg7[%c0_13, %c0_14], %70 {strides = array<i32>} : memref<8x32xf32, #tpu.memory_space<vmem>>, vector<8x32xf32>,
    return
  }
  func.func @transform_0(%arg0: i32) -> (i32, i32) {
    %c0_i32 = arith.constant 0 : i32
    %c0_i32_0 = arith.constant 0 : i32
    return %arg0, %c0_i32 : i32, i32
  }
  func.func @transform_1(%arg0: i32) -> (i32, i32) {
    %c0_i32 = arith.constant 0 : i32
    %c0_i32_0 = arith.constant 0 : i32
    %c0_i32_1 = arith.constant 0 : i32
    return %c0_i32, %c0_i32_0 : i32, i32
  }
  func.func @transform_2(%arg0: i32) -> (i32, i32) {
    %c0_i32 = arith.constant 0 : i32
    %c0_i32_0 = arith.constant 0 : i32
    %c0_i32_1 = arith.constant 0 : i32
    return %c0_i32, %c0_i32_0 : i32, i32
  }
  func.func @transform_3(%arg0: i32) -> (i32, i32) {
    %c0_i32 = arith.constant 0 : i32
    %c0_i32_0 = arith.constant 0 : i32
    %c0_i32_1 = arith.constant 0 : i32
    return %c0_i32, %c0_i32_0 : i32, i32
  }
  func.func @transform_4(%arg0: i32) -> (i32, i32) {
    %c0_i32 = arith.constant 0 : i32
    %c0_i32_0 = arith.constant 0 : i32
    %c0_i32_1 = arith.constant 0 : i32
    return %c0_i32, %c0_i32_0 : i32, i32
  }
  func.func @transform_5(%arg0: i32) -> (i32, i32) {
    %c0_i32 = arith.constant 0 : i32
    %c0_i32_0 = arith.constant 0 : i32
    %c0_i32_1 = arith.constant 0 : i32
    return %c0_i32, %c0_i32_0 : i32, i32
  }
  func.func @transform_6(%arg0: i32) -> (i32, i32) {
    %c0_i32 = arith.constant 0 : i32
    %c0_i32_0 = arith.constant 0 : i32
    return %arg0, %c0_i32 : i32, i32
  }
}

</mosaic_0001>

<bundles_post_ra>
// kernel: time_embedding.1
= control target key start
LH: loop header
LB: loop body
LE: loop exit
PB: predicated region body
PF: predicated region fallthrough
CT: control target
= control target key end

     0   :  { %11 = vsyncpa [#allocation3], 0  ;;  %s598_s0 = inlined_call_operand.vmem [shape: f32[8,1], index: 0, kind: input, shape index: {}]   ;;  %s599_s1 = inlined_call_operand.vmem [shape: f32[2,8], index: 1, kind: input, shape index: {}]   ;;  %s600_s2 = inlined_call_operand.vmem [shape: f32[8,32], index: 2, kind: input, shape index: {}]   ;;  %s601_s3 = inlined_call_operand.vmem [shape: f32[1,32], index: 3, kind: input, shape index: {}]   ;;  %s602_s4 = inlined_call_operand.hbm [shape: f32[32,32], index: 4, kind: input, shape index: {}]   ;;  %s603_s5 = inlined_call_operand.vmem [shape: f32[1,32], index: 5, kind: input, shape index: {}]   ;;  %s604_s6 = inlined_call_operand.hbm [shape: f32[8,32], index: 6, kind: output, shape index: {}]  }
   0x1   :  { %12 = vsyncpa [#allocation4], 0  ;;  %s479_s21 = smov [#allocation2]   ;;  %s431_s25 = scalar_lea.hbm %s602_s4, 512 }
   0x2   :  { %s26_s22 = sshll.u32 %s479_s21, 4  ;;  %p432_p0 = scmp.ne.s32.totalorder %s602_s4, %s431_s25  ;;  %s27_s22 = int_to_ptr.vmem [resolvable:$true] %s26_s22 }
   0x3   :  { %p435_p1 = scmp.lt.u32.totalorder %s431_s25, %s602_s4 }
   0x5   :  { %p437_p2 = pnand %p435_p1, %p432_p0 }
   0x7   :  { %440 = shalt.err (!%p437_p2)
}
   0x8   :  { %s441_s30 = scalar_lea.vmem %s27_s22, 512  ;;  %p446_p4 = scmp.lt.s32.totalorder %s27_s22, %s27_s22 }
   0x9   :  { %p442_p3 = scmp.ne.s32.totalorder %s27_s22, %s441_s30  ;;  %p447_p5 = scmp.lt.s32.totalorder %s441_s30, %s441_s30 }
   0xb   :  { %p448_p6 = por %p447_p5, %p446_p4 }
   0xd   :  { %p449_p7 = pnand %p448_p6, %p442_p3 }
   0xf   :  { %452 = shalt.err (!%p449_p7)
}
  0x10   :  { %s480_s7 = smov 128   ;;  %s481_s8 = smov 8  }
  0x11   :  { %32 = dma.hbm_to_vmem [thread:$0]  %s602_s4, 512, %s27_s22, [#allocation3], %s480_s7, %s480_s7, %s481_s8  }
  0x12   :  { %475 = dma.done.wait [#allocation3], 512  }
  0x13   :  { %476 = vsyncadd [#allocation3], 4294966784  ;;  %v482_v0 = vmov 0   ;;  %v38_v1 = vld [vmem:[%s598_s0] sm:$0xff]  ;;  %v483_v2 = vmov 1   ;;  %vm497_vm13 = vmmov 0  }
  0x14   :  { %414 = vset.pattern.permute.xlu0 %v482_v0  ;;  %415 = vset.pattern.permute.xlu1 %v483_v2  ;;  %v357_v3 = vld [vmem:[%s599_s1] ss:$0 sm:$0xff]  ;;  %v358_v4 = vld [vmem:[%s599_s1 + $0x1] ss:$0 sm:$0xff]  ;;  %v484_v18 = vmov 683565275  }
  0x15   :  { %42 = vperm.xlu0 %414, %v38_v1   ;;  %v485_v20 = vmov 2475754826   ;;  %v486_v23 = vmov 2131351028   ;;  %v487_v26 = vmov 2102212464  }
  0x16   :  { %v488_v29 = vmov 920167782   ;;  %v489_v32 = vmov 1326507024   ;;  %vm267_vm14 = vcmask 261120   ;;  %s499_s18 = smov [#allocation5]  }
  0x17   :  { %s348_s19 = sshll.u32 %s499_s18, 4  ;;  %s349_s19 = int_to_ptr.vmem [resolvable:$true] %s348_s19 }
  0x18   :  { %s453_s20 = scalar_lea.vmem %s349_s19, 128  ;;  %p458_p9 = scmp.lt.s32.totalorder %s349_s19, %s349_s19 }
  0x19   :  { %p454_p8 = scmp.ne.s32.totalorder %s349_s19, %s453_s20  ;;  %p459_p10 = scmp.lt.s32.totalorder %s453_s20, %s453_s20 }
  0x1b   :  { %p460_p11 = por %p459_p10, %p458_p9 }
  0x1d   :  { %p461_p12 = pnand %p460_p11, %p454_p8 }
  0x94   :  { %v43_v5 = vpop.permute.xlu0 %42 }
  0x95   :  { %v49_v6 = vmul.f32 %v357_v3, %v43_v5 }
  0x97   :  { %v556_v7 = vadd.f32 %v358_v4, %v49_v6 }
  0x99   :  { %v59_v8 = vand.u32 2139095040, %v556_v7  ;;  %v56_v12 = vand.u32 2147483647, %v556_v7  ;;  %vm58_vm7 = vcmp.lt.s32.totalorder %v556_v7, 0  ;;  %vm148_vm12 = vweird.f32 %v556_v7 }
  0x9b   :  { %v60_v9 = vshrl.u32 %v59_v8, 23  ;;  %v63_v15 = vand.u32 8388607, %v56_v12  ;;  %vm57_vm8 = vcmp.le.f32.partialorder %v56_v12, 0.7853982 }
  0x9d   :  { %v359_v10 = vadd.s32 4294967169, %v60_v9  ;;  %v64_v34 = vor.u32 8388608, %v63_v15 }
  0x9f   :  { %v66_v11 = vadd.s32 1, %v359_v10  ;;  %v104_v48 = vshll.u32 %v64_v34, 8 }
  0xa1   :  { %vm67_vm0 = vcmp.gt.s32.totalorder %v66_v11, 0 }
  0xa2   :  { %v68_v13 = vsel %vm67_vm0, %v66_v11, 0 }
  0xa3   :  { %v70_v14 = vand.u32 31, %v68_v13  ;;  %v69_v17 = vshrl.u32 %v68_v13, 5 }
  0xa5   :  { %v71_v16 = vsub.s32 32, %v70_v14  ;;  %v73_v19 = vshll.u32 %v484_v18, %v70_v14  ;;  %v76_v21 = vshll.u32 %v485_v20, %v70_v14  ;;  %v79_v25 = vshll.u32 %v486_v23, %v70_v14 }
  0xa6   :  { %v82_v28 = vshll.u32 %v487_v26, %v70_v14  ;;  %v85_v31 = vshll.u32 %v488_v29, %v70_v14  ;;  %vm88_vm1 = vcmp.lt.s32.totalorder %v69_v17, 1  ;;  %vm91_vm2 = vcmp.lt.s32.totalorder %v69_v17, 4 }
  0xa7   :  { %v74_v22 = vshrl.u32 %v485_v20, %v71_v16  ;;  %v77_v24 = vshrl.u32 %v486_v23, %v71_v16  ;;  %v80_v27 = vshrl.u32 %v487_v26, %v71_v16  ;;  %v83_v30 = vshrl.u32 %v488_v29, %v71_v16 }
  0xa8   :  { %v86_v33 = vshrl.u32 %v489_v32, %v71_v16  ;;  %v72_v43 = vshrl.u32 %v484_v18, %v71_v16  ;;  %vm90_vm3 = vcmp.lt.s32.totalorder %v69_v17, 3  ;;  %vm89_vm4 = vcmp.lt.s32.totalorder %v69_v17, 2 }
  0xa9   :  { %v75_v35 = vor.u32 %v74_v22, %v73_v19  ;;  %v78_v36 = vor.u32 %v77_v24, %v76_v21  ;;  %v81_v37 = vor.u32 %v80_v27, %v79_v25  ;;  %v84_v38 = vor.u32 %v83_v30, %v82_v28 }
  0xaa   :  { %v87_v39 = vor.u32 %v86_v33, %v85_v31 }
  0xab   :  { %v93_v40 = vsel %vm91_vm2, %v81_v37, 2102212464  ;;  %v96_v41 = vsel %vm88_vm1, %v75_v35, %v78_v36  ;;  %v100_v42 = vsel %vm88_vm1, %v78_v36, %v81_v37  ;;  %v97_v44 = vsel %vm91_vm2, %v84_v38, 920167782 }
  0xac   :  { %v101_v45 = vsel %vm91_vm2, %v87_v39, 1326507024  ;;  %v98_v46 = vsel %vm90_vm3, %v81_v37, %v97_v44  ;;  %v92_v49 = vsel %vm88_vm1, %v72_v43, %v75_v35  ;;  %v94_v50 = vsel %vm90_vm3, %v78_v36, %v93_v40 }
  0xad   :  { %v102_v47 = vsel %vm90_vm3, %v84_v38, %v101_v45  ;;  %v99_v51 = vsel %vm89_vm4, %v96_v41, %v98_v46  ;;  %v95_v57 = vsel %vm89_vm4, %v92_v49, %v94_v50  ;;  %v490_v36 = vmov 2   ;;  %v258_v45 = vld [vmem:[#allocation2 + $0x10] sm:$0xff]  ;;  %v259_v46 = vld [vmem:[#allocation2 + $0x18] sm:$0xff] }
  0xae   :  { %v103_v52 = vsel %vm89_vm4, %v100_v42, %v102_v47  ;;  %v565_v55 = vmul.u32.u64.low %v104_v48, %v99_v51  ;;  %v566_v56 = vmul.u32.u64.high %v104_v48, %v99_v51, %v565_v55  ;;  %v111_v59 = vmul.u32 %v104_v48, %v95_v57  ;;  %v257_v42 = vld [vmem:[#allocation2 + $0x8] sm:$0xff] }
  0xaf   :  { %v562_v53 = vmul.u32.u64.low %v104_v48, %v103_v52  ;;  %v563_v54 = vmul.u32.u64.high %v104_v48, %v103_v52, %v562_v53  ;;  %v491_v37 = vmov 3   ;;  %v492_v38 = vmov 4   ;;  %v160_v52 = vld [vmem:[%s600_s2] sm:$0xff] }
  0xb0   :  { %v114_v58 = vadd.s32 1, %v566_v56  ;;  %v493_v39 = vmov 6   ;;  %v494_v40 = vmov 5   ;;  %v495_v41 = vmov 7  }
  0xb1   :  { %vm113_vm5 = vc.u32 %v563_v54, %v565_v55  ;;  %v112_v8 = vadd.s32 %v565_v55, %v563_v54  ;;  %v496_v44 = vmov 0.0|0.0   ;;  %v387_v47 = vpack.c.bf16 %v259_v46, %v258_v45 }
  0xb2   :  { %v115_v60 = vsel %vm113_vm5, %v114_v58, %v566_v56  ;;  %383 = vmatprep.subr.bf16.mxu0 %v496_v44  ;;  %v498_v48 = vmov 0.0   ;;  %v167_v49 = vlaneseq  ;;  %v363_v58 = vld [vmem:[%s601_s3] ss:$0 sm:$0xff] }
  0xb3   :  { %v116_v61 = vadd.s32 %v115_v60, %v111_v59  ;;  %380 = vmatprep.mubr.msk.f32.mxu0 %vm497_vm13, %v498_v48 }
  0xb4   :  { %v168_v50 = vshrl.u32 %v167_v49, 7 }
  0xb5   :  { %v117_v62 = vadd.s32 536870912, %v116_v61 }
  0xb6   :  { %v169_v51 = vsub.s32 0, %v168_v50  ;;  %v185_v53 = vsub.s32 1, %v168_v50  ;;  %v195_v55 = vsub.s32 2, %v168_v50 }
  0xb7   :  { %v118_v63 = vshrl.u32 %v117_v62, 30  ;;  %v205_v62 = vsub.s32 3, %v168_v50 }
  0xb8   :  { %v170_v54 = vrot.slane %v160_v52, %v169_v51  ;;  %v186_v56 = vrot.slane %v160_v52, %v185_v53 }
  0xb9   :  { %v119_v0 = vshll.u32 %v118_v63, 30  ;;  %v142_v21 = vsub.s32 4, %v118_v63 }
  0xbb   :  { %v120_v1 = vsub.s32 %v116_v61, %v119_v0  ;;  %v143_v24 = vsel %vm58_vm7, %v142_v21, %v118_v63  ;;  %v196_v61 = vrot.slane %v160_v52, %v195_v55 }
  0xbc   :  { %v145_v26 = vsel %vm57_vm8, 0, %v143_v24 }
  0xbd   :  { %v122_v2 = vsub.s32 0, %v120_v1  ;;  %v149_v27 = vadd.s32 3, %v145_v26 }
  0xbf   :  { %v360_v3 = vmin.u32 %v122_v2, %v120_v1  ;;  %v150_v28 = vand.u32 3, %v149_v27 }
  0xc1   :  { %v124_v4 = vclz %v360_v3  ;;  %vm155_vm9 = vcmp.eq.s32.totalorder %v150_v28, 2  ;;  %vm152_vm10 = vcmp.eq.s32.totalorder %v150_v28, 0  ;;  %vm151_vm11 = vcmp.lt.s32.totalorder %v150_v28, 2 }
  0xc3   :  { %v361_v5 = vadd.s32 4294967294, %v124_v4 }
  0xc5   :  { %vm362_vm6 = vcmp.lt.s32.totalorder %v361_v5, 0 }
  0xc6   :  { %v127_v6 = vsel %vm362_vm6, 0, %v361_v5  ;;  %v206_v5 = vrot.slane %v160_v52, %v205_v62 }
  0xc7   :  { %v128_v9 = vsub.s32 32, %v127_v6  ;;  %v132_v10 = vsub.s32 4294967266, %v127_v6  ;;  %v129_v11 = vshll.u32 %v120_v1, %v127_v6  ;;  %v215_v1 = vsub.s32 4, %v168_v50 }
  0xc9   :  { %v130_v13 = vshrl.u32 %v112_v8, %v128_v9  ;;  %v133_v14 = vadd.s32 127, %v132_v10  ;;  %v216_v9 = vrot.slane %v160_v52, %v215_v1  ;;  %v225_v10 = vsub.s32 5, %v168_v50 }
  0xcb   :  { %v131_v15 = vor.u32 %v130_v13, %v129_v11  ;;  %v134_v16 = vshll.u32 %v133_v14, 23  ;;  %v235_v14 = vsub.s32 6, %v168_v50 }
  0xcd   :  { %v135_v17 = vor.u32 4788187, %v134_v16  ;;  %v138_v19 = vcvt.s32.f32 %v131_v15 }
  0xcf   :  { %v136_v18 = vand.u32 2147483647, %v135_v17  ;;  %v226_v17 = vrot.slane %v160_v52, %v225_v10 }
  0xd1   :  { %v139_v20 = vmul.f32 %v138_v19, %v136_v18  ;;  %v245_v18 = vsub.s32 7, %v168_v50  ;;  %v236_v19 = vrot.slane %v160_v52, %v235_v14 }
  0xd3   :  { %v140_v22 = vxor.u32 2147483648, %v139_v20  ;;  %v246_v24 = vrot.slane %v160_v52, %v245_v18 }
  0xd5   :  { %v141_v23 = vsel %vm58_vm7, %v140_v22, %v139_v20 }
  0xd6   :  { %v144_v25 = vsel %vm57_vm8, %v556_v7, %v141_v23  ;;  %v256_v7 = vld [vmem:[#allocation2] sm:$0xff] }
  0xd7   :  { %423 = vcosq.f32 %v144_v25  ;;  %v384_v43 = vpack.c.bf16 %v257_v42, %v256_v7 }
  0xd8   :  { %425 = vsinq.f32 %v144_v25 }
  0xd9   :  { %385 = vmatpush3.bf16.msra.mxu0 %v384_v43 }
  0xda   :  { %386 = vmatprep.subr.bf16.mxu0 %v496_v44 }
  0xdd   :  { %388 = vmatpush3.bf16.msra.mxu0 %v387_v47 }
  0xe1   :  { %v424_v29 = vpop.eup %423 }
  0xe2   :  { %v426_v30 = vpop.eup %425  ;;  %v156_v31 = vxor.u32 2147483648, %v424_v29 }
  0xe3   :  { %v153_v32 = vxor.u32 2147483648, %v426_v30 }
  0xe4   :  { %v157_v33 = vsel %vm155_vm9, %v156_v31, %v426_v30 }
  0xe5   :  { %v154_v34 = vsel %vm152_vm10, %v424_v29, %v153_v32 }
  0xe6   :  { %v158_v12 = vsel %vm151_vm11, %v154_v34, %v157_v33 }
  0xe7   :  { %v159_v35 = vsel %vm148_vm12, nan, %v158_v12 }
  0xe8   :  { %180 = vperm.xlu1 %415, %v159_v35   ;;  %164 = vperm.xlu0 %414, %v159_v35  }
  0xec   :  { %416 = vset.pattern.permute.xlu1 %v490_v36  ;;  %417 = vset.pattern.permute.xlu0 %v491_v37 }
  0xed   :  { %190 = vperm.xlu1 %416, %v159_v35   ;;  %200 = vperm.xlu0 %417, %v159_v35  }
  0xf1   :  { %418 = vset.pattern.permute.xlu1 %v492_v38  ;;  %420 = vset.pattern.permute.xlu0 %v493_v39 }
  0xf2   :  { %210 = vperm.xlu1 %418, %v159_v35   ;;  %230 = vperm.xlu0 %420, %v159_v35  }
  0xf6   :  { %419 = vset.pattern.permute.xlu1 %v494_v40  ;;  %422 = vset.pattern.permute.xlu0 %v495_v41 }
  0xf7   :  { %220 = vperm.xlu1 %419, %v159_v35  }
  0xfb   :  { %421 = vset.pattern.permute.xlu1 %v495_v41 }
  0xfc   :  { %240 = vperm.xlu1 %421, %v159_v35   ;;  %v365_v35 = vld [vmem:[%s603_s5] ss:$0 sm:$0xff] }
 0x167   :  { %v181_v57 = vpop.permute.xlu1 %180  ;;  %v165_v59 = vpop.permute.xlu0 %164 }
 0x168   :  { %v171_v60 = vmul.f32 %v170_v54, %v165_v59  ;;  %v187_v63 = vmul.f32 %v186_v56, %v181_v57 }
 0x16a   :  { %v178_v0 = vadd.f32 %v363_v58, %v171_v60 }
 0x16c   :  { %v191_v2 = vpop.permute.xlu1 %190  ;;  %v188_v3 = vadd.f32 %v187_v63, %v178_v0  ;;  %v201_v6 = vpop.permute.xlu0 %200 }
 0x16d   :  { %v197_v4 = vmul.f32 %v196_v61, %v191_v2  ;;  %v207_v11 = vmul.f32 %v206_v5, %v201_v6 }
 0x16f   :  { %v198_v8 = vadd.f32 %v197_v4, %v188_v3 }
 0x171   :  { %v211_v13 = vpop.permute.xlu1 %210  ;;  %v208_v15 = vadd.f32 %v207_v11, %v198_v8  ;;  %v231_v20 = vpop.permute.xlu0 %230 }
 0x172   :  { %v217_v16 = vmul.f32 %v216_v9, %v211_v13  ;;  %v237_v25 = vmul.f32 %v236_v19, %v231_v20 }
 0x174   :  { %v218_v22 = vadd.f32 %v217_v16, %v208_v15 }
 0x176   :  { %v221_v21 = vpop.permute.xlu1 %220 }
 0x177   :  { %v227_v23 = vmul.f32 %v226_v17, %v221_v21 }
 0x179   :  { %v228_v26 = vadd.f32 %v227_v23, %v218_v22 }
 0x17b   :  { %v241_v27 = vpop.permute.xlu1 %240  ;;  %v238_v28 = vadd.f32 %v237_v25, %v228_v26 }
 0x17c   :  { %v247_v29 = vmul.f32 %v246_v24, %v241_v27 }
 0x17e   :  { %v248_v30 = vadd.f32 %v247_v29, %v238_v28 }
 0x180   :  { %v364_v31 = vmul.f32 -1.442695, %v248_v30 }
 0x182   :  { %427 = vpow2.f32 %v364_v31 }
 0x18c   :  { %v428_v32 = vpop.eup %427 }
 0x18d   :  { %v252_v33 = vadd.f32 1.0, %v428_v32 }
 0x18f   :  { %429 = vrcp.f32 %v252_v33 }
 0x199   :  { %v430_v34 = vpop.eup %429 }
 0x19a   :  { %v255_v12 = vmul.f32 %v430_v34, %v248_v30 }
 0x19c   :  { %381 = vmatmul.mubr.msk.f32.vlgmr.msra.gmra.mrb[0].mxu0 %vm267_vm14, %v255_v12 }
 0x26f   :  { %v337_v36 = vpop.f32.mrb[0].mxu0 }
 0x270   :  { %v338_v37 = vadd.f32 %v365_v35, %v337_v36  ;;  %v382_v38 = vpop.f32.mrb[1].mxu0 }
 0x272   :  { %341 = vst.msk [vmem:[#allocation5] sm:$0xff] %vm267_vm14, %v338_v37 }
 0x273   :  { %464 = shalt.err (!%p461_p12)
}
 0x274   :  { %s465_s23 = scalar_lea.hbm %s604_s6, 128 }
 0x275   :  { %p466_p13 = scmp.ne.s32.totalorder %s604_s6, %s465_s23  ;;  %p469_p0 = scmp.lt.u32.totalorder %s465_s23, %s604_s6 }
 0x277   :  { %p471_p1 = pnand %p469_p0, %p466_p13 }
 0x279   :  { %474 = shalt.err (!%p471_p1)
}
 0x27a   :  { %351 = dma.vmem_to_hbm [thread:$0]  %s349_s19, 128, %s604_s6, [#allocation4]  }
 0x27b   :  { %477 = dma.done.wait [#allocation4], 128  }
 0x27c   :  { %478 = vsyncadd [#allocation4], 4294967168 }
 0x27d   :  { %355 = vsyncpa [#allocation3], 1 }
 0x27e   :  { %356 = vsyncpa [#allocation4], 1 }

</bundles_post_ra>
